<compile_context>
chip_gen: v7x
topology: tpu7x:2x2x1
jax: 0.10.0
libtpu: 0.0.40
codegen_flags: <defaults>
</compile_context>

<pallas_src>
import jax
import jax.numpy as jnp
from jax.experimental import pallas as pl
from jax.experimental.pallas import tpu as pltpu


def _make_concat_conv_kernel(tap_offsets, n_batch, cin, hw, k_per_batch, k_total):
    """Single fused (Conv1x1 | Conv3x3-valid) + concat + bias kernel.

    Refs (single grid step):
      x_ref  : [N, Cin, HWP]        flattened NCHW image, lane-padded
      w_ref  : [N*Ctot, K_total]    block-diagonal fused weights + bias column
      o_ref  : [N*Ctot, HW]         full-resolution output slab (cropped later)
      xs_ref : [K_total, HW]        VMEM scratch holding the stacked operand
    """

    def kernel(x_ref, w_ref, o_ref, xs_ref):
        # Stage every shifted view once, up-front (hoisted off the MXU chain).
        # Column p of rows [base + t*Cin, base + (t+1)*Cin) is flattened input
        # pixel p + off_t of batch n; static, in-bounds lane slices.
        for n in range(n_batch):
            base = n * k_per_batch
            for t, off in enumerate(tap_offsets):
                xs_ref[base + t * cin: base + (t + 1) * cin, :] = (
                    x_ref[n, :, off:off + hw])
        # Constant-ones row folds the bias into the contraction (K -> K+1).
        xs_ref[k_total - 1:k_total, :] = jnp.ones((1, hw), jnp.float32)

        # One MXU pass computes every batch element, both branches and the
        # bias; the channel concat is implicit in the disjoint weight rows.
        o_ref[...] = jnp.dot(
            w_ref[...], xs_ref[...], preferred_element_type=jnp.float32
        ).astype(o_ref.dtype)

    return kernel


@jax.jit
def concat_forward(x_nchw, w0, b0, w1, b1):
    """Forward pass of Concat(dim=1, Conv1x1, Conv3x3_valid).

    x_nchw: [N, Cin, H, W] float32
    w0: [C0, Cin, 1, 1], b0: [C0]   (1x1 conv)
    w1: [C1, Cin, 3, 3], b1: [C1]   (3x3 valid conv)
    returns: [N, C0+C1, H-2, W-2]  (NCHW)
    """
    N, Cin, H, W = x_nchw.shape
    C0 = w0.shape[0]
    C1, _, KH, KW = w1.shape
    Hc, Wc = H - KH + 1, W - KW + 1          # min spatial size across branches
    Ctot = C0 + C1
    HW = H * W
    T = KH * KW

    # Center-crop offsets of branch 0.  The fold below is only valid while the
    # crop offset coincides with one of branch 1's conv taps.
    dh, dw = (H - Hc) // 2, (W - Wc) // 2
    assert 0 <= dh < KH and 0 <= dw < KW, "crop offset must name a conv tap"
    center = dh * KW + dw

    # Fused per-tap weights, flattened to the 2-D layout the matmul wants:
    # rows 0..C0-1 carry branch 0 only at the center tap, rows C0.. carry
    # branch 1 at every tap -> [Ctot, T*Cin].
    w1_taps = jnp.transpose(w1, (0, 2, 3, 1)).reshape(C1, T, Cin)
    w0_taps = jnp.zeros((C0, T, Cin), w0.dtype).at[:, center, :].set(w0[:, :, 0, 0])
    w_flat = jnp.concatenate([w0_taps, w1_taps], axis=0).reshape(Ctot, T * Cin)
    b_cat = jnp.concatenate([b0, b1])                                # [Ctot]

    # Block-diagonal weight folds the batch into the output rows and the bias
    # into one extra K column: the whole forward becomes a single
    # [N*Ctot, Ktot] @ [Ktot, HW] MXU pass in one grid step.
    Kb = T * Cin
    Ktot = N * Kb + 1
    w_big = jnp.zeros((N * Ctot, Ktot), jnp.float32)
    for n in range(N):
        w_big = w_big.at[n * Ctot:(n + 1) * Ctot, n * Kb:(n + 1) * Kb].set(w_flat)
        w_big = w_big.at[n * Ctot:(n + 1) * Ctot, Ktot - 1].set(b_cat)

    # Flatten spatial dims onto the lane axis (contiguous -> free) and zero-pad
    # by one lane tile so every shifted in-kernel slice stays inside this batch
    # element's slab (never reads the next element's pixels).
    tap_offsets = tuple(di * W + dj for di in range(KH) for dj in range(KW))
    max_off = max(tap_offsets)
    HWP = HW + ((max_off + 127) // 128) * 128
    assert HWP - HW >= max_off, "lane padding must cover the largest tap shift"
    x_pad = jnp.pad(x_nchw.reshape(N, Cin, HW), ((0, 0), (0, 0), (0, HWP - HW)))

    kernel = _make_concat_conv_kernel(tap_offsets, N, Cin, HW, Kb, Ktot)
    out_flat = pl.pallas_call(
        kernel,
        out_shape=jax.ShapeDtypeStruct((N * Ctot, HW), jnp.float32),
        grid=(1,),
        in_specs=[
            pl.BlockSpec((N, Cin, HWP), lambda i: (0, 0, 0)),
            pl.BlockSpec((N * Ctot, Ktot), lambda i: (0, 0)),
        ],
        out_specs=pl.BlockSpec((N * Ctot, HW), lambda i: (0, 0)),
        scratch_shapes=[pltpu.VMEM((Ktot, HW), jnp.float32)],
        compiler_params=pltpu.CompilerParams(
            dimension_semantics=("arbitrary",),
        ),
    )(x_pad, w_big)

    # Rows are already (batch, channel)-major and columns (H, W)-major, so only
    # a reshape + valid-window crop remains (no transpose, no extra padding).
    return out_flat.reshape(N, Ctot, H, W)[:, :, :Hc, :Wc]


def _reference(x_nchw, w0, b0, w1, b1):
    """Pure-JAX reference (lax conv) mirroring the PyTorch forward."""
    dn = jax.lax.conv_dimension_numbers(x_nchw.shape, w0.shape, ("NCHW", "OIHW", "NCHW"))
    y0 = jax.lax.conv_general_dilated(
        x_nchw, w0, (1, 1), "VALID", dimension_numbers=dn,
        precision=jax.lax.Precision.HIGHEST)
    y0 = y0 + b0.reshape(1, -1, 1, 1)
    dn1 = jax.lax.conv_dimension_numbers(x_nchw.shape, w1.shape, ("NCHW", "OIHW", "NCHW"))
    y1 = jax.lax.conv_general_dilated(
        x_nchw, w1, (1, 1), "VALID", dimension_numbers=dn1,
        precision=jax.lax.Precision.HIGHEST)
    y1 = y1 + b1.reshape(1, -1, 1, 1)
    Hc, Wc = y1.shape[2], y1.shape[3]
    d2 = (y0.shape[2] - Hc) // 2
    d3 = (y0.shape[3] - Wc) // 2
    y0c = y0[:, :, d2:d2 + Hc, d3:d3 + Wc]
    return jnp.concatenate([y0c, y1], axis=1)


if __name__ == "__main__":
    N, Cin, H, W = 2, 4, 16, 16
    C0, C1 = 8, 8

    key = jax.random.PRNGKey(0)
    kx, kw0, kb0, kw1, kb1 = jax.random.split(key, 5)
    x = jax.random.normal(kx, (N, Cin, H, W), dtype=jnp.float32)
    w0 = jax.random.normal(kw0, (C0, Cin, 1, 1), dtype=jnp.float32) * 0.1
    b0 = jax.random.normal(kb0, (C0,), dtype=jnp.float32) * 0.1
    w1 = jax.random.normal(kw1, (C1, Cin, 3, 3), dtype=jnp.float32) * 0.1
    b1 = jax.random.normal(kb1, (C1,), dtype=jnp.float32) * 0.1

    out = concat_forward(x, w0, b0, w1, b1)
    out = jax.block_until_ready(out)

    ref = _reference(x, w0, b0, w1, b1)
    assert out.shape == (N, C0 + C1, H - 2, W - 2), out.shape
    assert jnp.allclose(out, ref, atol=1e-4, rtol=1e-4), float(jnp.abs(out - ref).max())

    print("KERNEL_OK")
</pallas_src>

<mosaic_0001>
module attributes {stable_mosaic.version = 11 : i64} {
  func.func @kernel(%arg0: i32, %arg1: memref<2x4x384xf32, #tpu.memory_space<vmem>>, %arg2: memref<32x73xf32, #tpu.memory_space<vmem>>, %arg3: memref<32x256xf32, #tpu.memory_space<vmem>>, %arg4: memref<73x256xf32, #tpu.memory_space<vmem>>) attributes {dimension_semantics = [#tpu.dimension_semantics<arbitrary>], iteration_bounds = array<i64: 1>, scalar_prefetch = 0 : i64, scratch_operands = 1 : i64, tpu.core_type = #tpu.core_type<tc>, window_params = [{pipeline_mode = #tpu.pipeline_mode<synchronous>, transform_indices = @transform_0, window_bounds = array<i64: 2, 4, 384>}, {pipeline_mode = #tpu.pipeline_mode<synchronous>, transform_indices = @transform_1, window_bounds = array<i64: 32, 73>}, {pipeline_mode = #tpu.pipeline_mode<synchronous>, transform_indices = @transform_2, window_bounds = array<i64: 32, 256>}]} {
    %c0 = arith.constant 0 : index
    %c0_0 = arith.constant 0 : index
    %c0_1 = arith.constant 0 : index
    %0 = vector.load %arg1[%c0, %c0_0, %c0_1] : memref<2x4x384xf32, #tpu.memory_space<vmem>>, vector<1x4x256xf32>
    %1 = vector.shape_cast %0 : vector<1x4x256xf32> to vector<4x256xf32>
    %c0_2 = arith.constant 0 : index
    %c0_3 = arith.constant 0 : index
    %2 = vector.load %arg4[%c0_2, %c0_3] : memref<73x256xf32, #tpu.memory_space<vmem>>, vector<4x256xf32>
    tpu.vector_store %arg4[%c0_2, %c0_3], %1 {strides = array<i32>} : memref<73x256xf32, #tpu.memory_space<vmem>>, vector<4x256xf32>,
    %c0_4 = arith.constant 0 : index
    %c0_5 = arith.constant 0 : index
    %c1 = arith.constant 1 : index
    %3 = vector.load %arg1[%c0_4, %c0_5, %c1] : memref<2x4x384xf32, #tpu.memory_space<vmem>>, vector<1x4x256xf32>
    %4 = vector.shape_cast %3 : vector<1x4x256xf32> to vector<4x256xf32>
    %c4 = arith.constant 4 : index
    %c0_6 = arith.constant 0 : index
    %5 = vector.load %arg4[%c4, %c0_6] : memref<73x256xf32, #tpu.memory_space<vmem>>, vector<4x256xf32>
    tpu.vector_store %arg4[%c4, %c0_6], %4 {strides = array<i32>} : memref<73x256xf32, #tpu.memory_space<vmem>>, vector<4x256xf32>,
    %c0_7 = arith.constant 0 : index
    %c0_8 = arith.constant 0 : index
    %c2 = arith.constant 2 : index
    %6 = vector.load %arg1[%c0_7, %c0_8, %c2] : memref<2x4x384xf32, #tpu.memory_space<vmem>>, vector<1x4x256xf32>
    %7 = vector.shape_cast %6 : vector<1x4x256xf32> to vector<4x256xf32>
    %c8 = arith.constant 8 : index
    %c0_9 = arith.constant 0 : index
    %8 = vector.load %arg4[%c8, %c0_9] : memref<73x256xf32, #tpu.memory_space<vmem>>, vector<4x256xf32>
    tpu.vector_store %arg4[%c8, %c0_9], %7 {strides = array<i32>} : memref<73x256xf32, #tpu.memory_space<vmem>>, vector<4x256xf32>,
    %c0_10 = arith.constant 0 : index
    %c0_11 = arith.constant 0 : index
    %c16 = arith.constant 16 : index
    %9 = vector.load %arg1[%c0_10, %c0_11, %c16] : memref<2x4x384xf32, #tpu.memory_space<vmem>>, vector<1x4x256xf32>
    %10 = vector.shape_cast %9 : vector<1x4x256xf32> to vector<4x256xf32>
    %c12 = arith.constant 12 : index
    %c0_12 = arith.constant 0 : index
    %11 = vector.load %arg4[%c12, %c0_12] : memref<73x256xf32, #tpu.memory_space<vmem>>, vector<4x256xf32>
    tpu.vector_store %arg4[%c12, %c0_12], %10 {strides = array<i32>} : memref<73x256xf32, #tpu.memory_space<vmem>>, vector<4x256xf32>,
    %c0_13 = arith.constant 0 : index
    %c0_14 = arith.constant 0 : index
    %c17 = arith.constant 17 : index
    %12 = vector.load %arg1[%c0_13, %c0_14, %c17] : memref<2x4x384xf32, #tpu.memory_space<vmem>>, vector<1x4x256xf32>
    %13 = vector.shape_cast %12 : vector<1x4x256xf32> to vector<4x256xf32>
    %c16_15 = arith.constant 16 : index
    %c0_16 = arith.constant 0 : index
    %14 = vector.load %arg4[%c16_15, %c0_16] : memref<73x256xf32, #tpu.memory_space<vmem>>, vector<4x256xf32>
    tpu.vector_store %arg4[%c16_15, %c0_16], %13 {strides = array<i32>} : memref<73x256xf32, #tpu.memory_space<vmem>>, vector<4x256xf32>,
    %c0_17 = arith.constant 0 : index
    %c0_18 = arith.constant 0 : index
    %c18 = arith.constant 18 : index
    %15 = vector.load %arg1[%c0_17, %c0_18, %c18] : memref<2x4x384xf32, #tpu.memory_space<vmem>>, vector<1x4x256xf32>
    %16 = vector.shape_cast %15 : vector<1x4x256xf32> to vector<4x256xf32>
    %c20 = arith.constant 20 : index
    %c0_19 = arith.constant 0 : index
    %17 = vector.load %arg4[%c20, %c0_19] : memref<73x256xf32, #tpu.memory_space<vmem>>, vector<4x256xf32>
    tpu.vector_store %arg4[%c20, %c0_19], %16 {strides = array<i32>} : memref<73x256xf32, #tpu.memory_space<vmem>>, vector<4x256xf32>,
    %c0_20 = arith.constant 0 : index
    %c0_21 = arith.constant 0 : index
    %c32 = arith.constant 32 : index
    %18 = vector.load %arg1[%c0_20, %c0_21, %c32] : memref<2x4x384xf32, #tpu.memory_space<vmem>>, vector<1x4x256xf32>
    %19 = vector.shape_cast %18 : vector<1x4x256xf32> to vector<4x256xf32>
    %c24 = arith.constant 24 : index
    %c0_22 = arith.constant 0 : index
    %20 = vector.load %arg4[%c24, %c0_22] : memref<73x256xf32, #tpu.memory_space<vmem>>, vector<4x256xf32>
    tpu.vector_store %arg4[%c24, %c0_22], %19 {strides = array<i32>} : memref<73x256xf32, #tpu.memory_space<vmem>>, vector<4x256xf32>,
    %c0_23 = arith.constant 0 : index
    %c0_24 = arith.constant 0 : index
    %c33 = arith.constant 33 : index
    %21 = vector.load %arg1[%c0_23, %c0_24, %c33] : memref<2x4x384xf32, #tpu.memory_space<vmem>>, vector<1x4x256xf32>
    %22 = vector.shape_cast %21 : vector<1x4x256xf32> to vector<4x256xf32>
    %c28 = arith.constant 28 : index
    %c0_25 = arith.constant 0 : index
    %23 = vector.load %arg4[%c28, %c0_25] : memref<73x256xf32, #tpu.memory_space<vmem>>, vector<4x256xf32>
    tpu.vector_store %arg4[%c28, %c0_25], %22 {strides = array<i32>} : memref<73x256xf32, #tpu.memory_space<vmem>>, vector<4x256xf32>,
    %c0_26 = arith.constant 0 : index
    %c0_27 = arith.constant 0 : index
    %c34 = arith.constant 34 : index
    %24 = vector.load %arg1[%c0_26, %c0_27, %c34] : memref<2x4x384xf32, #tpu.memory_space<vmem>>, vector<1x4x256xf32>
    %25 = vector.shape_cast %24 : vector<1x4x256xf32> to vector<4x256xf32>
    %c32_28 = arith.constant 32 : index
    %c0_29 = arith.constant 0 : index
    %26 = vector.load %arg4[%c32_28, %c0_29] : memref<73x256xf32, #tpu.memory_space<vmem>>, vector<4x256xf32>
    tpu.vector_store %arg4[%c32_28, %c0_29], %25 {strides = array<i32>} : memref<73x256xf32, #tpu.memory_space<vmem>>, vector<4x256xf32>,
    %c1_30 = arith.constant 1 : index
    %c0_31 = arith.constant 0 : index
    %c0_32 = arith.constant 0 : index
    %27 = vector.load %arg1[%c1_30, %c0_31, %c0_32] : memref<2x4x384xf32, #tpu.memory_space<vmem>>, vector<1x4x256xf32>
    %28 = vector.shape_cast %27 : vector<1x4x256xf32> to vector<4x256xf32>
    %c36 = arith.constant 36 : index
    %c0_33 = arith.constant 0 : index
    %29 = vector.load %arg4[%c36, %c0_33] : memref<73x256xf32, #tpu.memory_space<vmem>>, vector<4x256xf32>
    tpu.vector_store %arg4[%c36, %c0_33], %28 {strides = array<i32>} : memref<73x256xf32, #tpu.memory_space<vmem>>, vector<4x256xf32>,
    %c1_34 = arith.constant 1 : index
    %c0_35 = arith.constant 0 : index
    %c1_36 = arith.constant 1 : index
    %30 = vector.load %arg1[%c1_34, %c0_35, %c1_36] : memref<2x4x384xf32, #tpu.memory_space<vmem>>, vector<1x4x256xf32>
    %31 = vector.shape_cast %30 : vector<1x4x256xf32> to vector<4x256xf32>
    %c40 = arith.constant 40 : index
    %c0_37 = arith.constant 0 : index
    %32 = vector.load %arg4[%c40, %c0_37] : memref<73x256xf32, #tpu.memory_space<vmem>>, vector<4x256xf32>
    tpu.vector_store %arg4[%c40, %c0_37], %31 {strides = array<i32>} : memref<73x256xf32, #tpu.memory_space<vmem>>, vector<4x256xf32>,
    %c1_38 = arith.constant 1 : index
    %c0_39 = arith.constant 0 : index
    %c2_40 = arith.constant 2 : index
    %33 = vector.load %arg1[%c1_38, %c0_39, %c2_40] : memref<2x4x384xf32, #tpu.memory_space<vmem>>, vector<1x4x256xf32>
    %34 = vector.shape_cast %33 : vector<1x4x256xf32> to vector<4x256xf32>
    %c44 = arith.constant 44 : index
    %c0_41 = arith.constant 0 : index
    %35 = vector.load %arg4[%c44, %c0_41] : memref<73x256xf32, #tpu.memory_space<vmem>>, vector<4x256xf32>
    tpu.vector_store %arg4[%c44, %c0_41], %34 {strides = array<i32>} : memref<73x256xf32, #tpu.memory_space<vmem>>, vector<4x256xf32>,
    %c1_42 = arith.constant 1 : index
    %c0_43 = arith.constant 0 : index
    %c16_44 = arith.constant 16 : index
    %36 = vector.load %arg1[%c1_42, %c0_43, %c16_44] : memref<2x4x384xf32, #tpu.memory_space<vmem>>, vector<1x4x256xf32>
    %37 = vector.shape_cast %36 : vector<1x4x256xf32> to vector<4x256xf32>
    %c48 = arith.constant 48 : index
    %c0_45 = arith.constant 0 : index
    %38 = vector.load %arg4[%c48, %c0_45] : memref<73x256xf32, #tpu.memory_space<vmem>>, vector<4x256xf32>
    tpu.vector_store %arg4[%c48, %c0_45], %37 {strides = array<i32>} : memref<73x256xf32, #tpu.memory_space<vmem>>, vector<4x256xf32>,
    %c1_46 = arith.constant 1 : index
    %c0_47 = arith.constant 0 : index
    %c17_48 = arith.constant 17 : index
    %39 = vector.load %arg1[%c1_46, %c0_47, %c17_48] : memref<2x4x384xf32, #tpu.memory_space<vmem>>, vector<1x4x256xf32>
    %40 = vector.shape_cast %39 : vector<1x4x256xf32> to vector<4x256xf32>
    %c52 = arith.constant 52 : index
    %c0_49 = arith.constant 0 : index
    %41 = vector.load %arg4[%c52, %c0_49] : memref<73x256xf32, #tpu.memory_space<vmem>>, vector<4x256xf32>
    tpu.vector_store %arg4[%c52, %c0_49], %40 {strides = array<i32>} : memref<73x256xf32, #tpu.memory_space<vmem>>, vector<4x256xf32>,
    %c1_50 = arith.constant 1 : index
    %c0_51 = arith.constant 0 : index
    %c18_52 = arith.constant 18 : index
    %42 = vector.load %arg1[%c1_50, %c0_51, %c18_52] : memref<2x4x384xf32, #tpu.memory_space<vmem>>, vector<1x4x256xf32>
    %43 = vector.shape_cast %42 : vector<1x4x256xf32> to vector<4x256xf32>
    %c56 = arith.constant 56 : index
    %c0_53 = arith.constant 0 : index
    %44 = vector.load %arg4[%c56, %c0_53] : memref<73x256xf32, #tpu.memory_space<vmem>>, vector<4x256xf32>
    tpu.vector_store %arg4[%c56, %c0_53], %43 {strides = array<i32>} : memref<73x256xf32, #tpu.memory_space<vmem>>, vector<4x256xf32>,
    %c1_54 = arith.constant 1 : index
    %c0_55 = arith.constant 0 : index
    %c32_56 = arith.constant 32 : index
    %45 = vector.load %arg1[%c1_54, %c0_55, %c32_56] : memref<2x4x384xf32, #tpu.memory_space<vmem>>, vector<1x4x256xf32>
    %46 = vector.shape_cast %45 : vector<1x4x256xf32> to vector<4x256xf32>
    %c60 = arith.constant 60 : index
    %c0_57 = arith.constant 0 : index
    %47 = vector.load %arg4[%c60, %c0_57] : memref<73x256xf32, #tpu.memory_space<vmem>>, vector<4x256xf32>
    tpu.vector_store %arg4[%c60, %c0_57], %46 {strides = array<i32>} : memref<73x256xf32, #tpu.memory_space<vmem>>, vector<4x256xf32>,
    %c1_58 = arith.constant 1 : index
    %c0_59 = arith.constant 0 : index
    %c33_60 = arith.constant 33 : index
    %48 = vector.load %arg1[%c1_58, %c0_59, %c33_60] : memref<2x4x384xf32, #tpu.memory_space<vmem>>, vector<1x4x256xf32>
    %49 = vector.shape_cast %48 : vector<1x4x256xf32> to vector<4x256xf32>
    %c64 = arith.constant 64 : index
    %c0_61 = arith.constant 0 : index
    %50 = vector.load %arg4[%c64, %c0_61] : memref<73x256xf32, #tpu.memory_space<vmem>>, vector<4x256xf32>
    tpu.vector_store %arg4[%c64, %c0_61], %49 {strides = array<i32>} : memref<73x256xf32, #tpu.memory_space<vmem>>, vector<4x256xf32>,
    %c1_62 = arith.constant 1 : index
    %c0_63 = arith.constant 0 : index
    %c34_64 = arith.constant 34 : index
    %51 = vector.load %arg1[%c1_62, %c0_63, %c34_64] : memref<2x4x384xf32, #tpu.memory_space<vmem>>, vector<1x4x256xf32>
    %52 = vector.shape_cast %51 : vector<1x4x256xf32> to vector<4x256xf32>
    %c68 = arith.constant 68 : index
    %c0_65 = arith.constant 0 : index
    %53 = vector.load %arg4[%c68, %c0_65] : memref<73x256xf32, #tpu.memory_space<vmem>>, vector<4x256xf32>
    tpu.vector_store %arg4[%c68, %c0_65], %52 {strides = array<i32>} : memref<73x256xf32, #tpu.memory_space<vmem>>, vector<4x256xf32>,
    %cst = arith.constant 1.000000e+00 : f32
    %54 = vector.broadcast %cst : f32 to vector<1x256xf32>
    %c72 = arith.constant 72 : index
    %c0_66 = arith.constant 0 : index
    %55 = vector.load %arg4[%c72, %c0_66] : memref<73x256xf32, #tpu.memory_space<vmem>>, vector<1x256xf32>
    tpu.vector_store %arg4[%c72, %c0_66], %54 {strides = array<i32>} : memref<73x256xf32, #tpu.memory_space<vmem>>, vector<1x256xf32>,
    %c0_67 = arith.constant 0 : index
    %c0_68 = arith.constant 0 : index
    %56 = vector.load %arg2[%c0_67, %c0_68] : memref<32x73xf32, #tpu.memory_space<vmem>>, vector<32x73xf32>
    %c0_69 = arith.constant 0 : index
    %c0_70 = arith.constant 0 : index
    %57 = vector.load %arg4[%c0_69, %c0_70] : memref<73x256xf32, #tpu.memory_space<vmem>>, vector<73x256xf32>
    %cst_71 = arith.constant dense<0.000000e+00> : vector<32x256xf32>
    %58 = tpu.matmul %56, %57, %cst_71 {dimension_numbers = #tpu.dot_dimension_numbers<[1], [0], [0], [1], [0, 0, 1, 1], [], []>} : vector<32x73xf32>, vector<73x256xf32>, vector<32x256xf32> -> vector<32x256xf32>
    %c0_72 = arith.constant 0 : index
    %c0_73 = arith.constant 0 : index
    %59 = vector.load %arg3[%c0_72, %c0_73] : memref<32x256xf32, #tpu.memory_space<vmem>>, vector<32x256xf32>
    tpu.vector_store %arg3[%c0_72, %c0_73], %58 {strides = array<i32>} : memref<32x256xf32, #tpu.memory_space<vmem>>, vector<32x256xf32>,
    return
  }
  func.func @transform_0(%arg0: i32) -> (i32, i32, i32) {
    %c0_i32 = arith.constant 0 : i32
    %c0_i32_0 = arith.constant 0 : i32
    %c0_i32_1 = arith.constant 0 : i32
    %c0_i32_2 = arith.constant 0 : i32
    return %c0_i32, %c0_i32_0, %c0_i32_1 : i32, i32, i32
  }
  func.func @transform_1(%arg0: i32) -> (i32, i32) {
    %c0_i32 = arith.constant 0 : i32
    %c0_i32_0 = arith.constant 0 : i32
    %c0_i32_1 = arith.constant 0 : i32
    return %c0_i32, %c0_i32_0 : i32, i32
  }
  func.func @transform_2(%arg0: i32) -> (i32, i32) {
    %c0_i32 = arith.constant 0 : i32
    %c0_i32_0 = arith.constant 0 : i32
    %c0_i32_1 = arith.constant 0 : i32
    return %c0_i32, %c0_i32_0 : i32, i32
  }
}

</mosaic_0001>

<bundles_post_ra>
// kernel: concat_forward.1
= control target key start
LH: loop header
LB: loop body
LE: loop exit
PB: predicated region body
PF: predicated region fallthrough
CT: control target
= control target key end

     0   :  { %s542_s13 = smov 126   ;;  %s543_s14 = smov 127   ;;  %v312_v20 = vlaneseq  ;;  %v550_v21 = vmov 1.0   ;;  %v551_v24 = vmov 0.0   ;;  %vm47_vm1 = vcmask 1031168   ;;  %s764_s0 = inlined_call_operand.vmem [shape: f32[2,4,384], index: 0, kind: input, shape index: {}]   ;;  %s765_s1 = inlined_call_operand.vmem [shape: f32[32,73], index: 1, kind: input, shape index: {}]   ;;  %s766_s2 = inlined_call_operand.vmem [shape: f32[32,256], index: 2, kind: output, shape index: {}]  }
   0x1   :  { %v37_v0 = vld [vmem:[%s764_s0 + $0x8] sm:$0xf]  ;;  %v17_v1 = vld [vmem:[%s764_s0] sm:$0xff]  ;;  %v582_v4 = vld [vmem:[%s764_s0 + $0xc] sm:$0xff]  ;;  %s544_s21 = smov 112   ;;  %s545_s22 = smov 111   ;;  %427 = vmatprep.mubr.f32.mxu0 %v551_v24  ;;  %439 = vmatprep.mubr.f32.mxu1 %v551_v24 }
   0x2   :  { %45 = vrot.lane.b32.xlu1 %v37_v0, %s542_s13  ;;  %25 = vrot.lane.b32.xlu0 %v17_v1, %s543_s14  ;;  %v40_v2 = vcombine.high %v17_v1, %v17_v1  ;;  %v532_v3 = vld [vmem:[%s764_s0 + $0x8] ss:$0 sps:$4 sm:$0xff]   ;;  %15 = vst [vmem:[#allocation2] sm:$0xf] %v17_v1  ;;  %v591_v6 = vcombine.low %v582_v4, %v582_v4  ;;  %171 = vst [vmem:[#allocation2 + $0x48] sm:$0xf0] %v582_v4 }
   0x3   :  { %v533_v5 = vld [vmem:[%s764_s0 + $0x8] ss:$0 sps:$4 sm:$0xff]   ;;  %v21_v7 = vcombine.low %v17_v1, %v17_v1  ;;  %s546_s25 = smov 110   ;;  %s547_s28 = smov 96   ;;  %v176_v12 = vcombine.high %v582_v4, %v582_v4  ;;  %v466_v14 = vld [vmem:[%s764_s0 + $0x14] sm:$0xf] }
   0x4   :  { %16 = vst [vmem:[#allocation2 + $0x8] sm:$0xf] %v40_v2  ;;  %170 = vst [vmem:[#allocation2 + $0x40] sm:$0xf0] %v591_v6  ;;  %v74_v8 = vld [vmem:[%s764_s0 + $0x8] sm:$0xf] }
   0x5   :  { %v534_v9 = vld [vmem:[%s764_s0 + $0x8] ss:$0 sps:$4 sm:$0xff]   ;;  %s548_s3 = smov 95   ;;  %s549_s6 = smov 94   ;;  %v538_v15 = vld [vmem:[%s764_s0 + $0x14] ss:$0 sps:$4 sm:$0xff]  }
   0x6   :  { %43 = vrot.lane.b32.xlu1 %v40_v2, %s542_s13  ;;  %27 = vrot.lane.b32.xlu0 %v532_v3, %s543_s14  ;;  %v111_v10 = vld [vmem:[%s764_s0 + $0x8] sm:$0xf]  ;;  %v470_v16 = vld [vmem:[%s764_s0 + $0x14] sm:$0xf]  ;;  %vm314_vm0 = vcmp.lt.s32.totalorder %v312_v20, 256  ;;  %vm29_vm2 = vcmask 1039360  }
   0x7   :  { %v535_v11 = vld [vmem:[%s764_s0 + $0x8] ss:$0 sps:$4 sm:$0xff]   ;;  %v539_v17 = vld [vmem:[%s764_s0 + $0x14] ss:$0 sps:$4 sm:$0xff]   ;;  %vm66_vm3 = vcmask 916480   ;;  %vm84_vm4 = vcmask 908288  }
   0x8   :  { %v148_v13 = vld [vmem:[%s764_s0 + $0x8] sm:$0xf]  ;;  %v474_v18 = vld [vmem:[%s764_s0 + $0x14] sm:$0xf]  ;;  %vm103_vm5 = vcmask 900096   ;;  %vm121_vm6 = vcmask 785408  }
   0x9   :  { %v540_v19 = vld [vmem:[%s764_s0 + $0x14] ss:$0 sps:$4 sm:$0xff]   ;;  %317 = vst.msk [vmem:[#allocation2 + $0x90] ss:$8 sm:$0x3] %vm314_vm0, %v550_v21  ;;  %vm140_vm7 = vcmask 777216  }
   0xa   :  { %64 = vrot.lane.b32.xlu1 %v533_v5, %s544_s21  ;;  %62 = vrot.lane.b32.xlu0 %v17_v1, %s544_s21  ;;  %v478_v22 = vld [vmem:[%s764_s0 + $0x14] sm:$0xf]  ;;  %vm158_vm8 = vcmask 769024   ;;  %vm356_vm9 = vcmask 1040384   ;;  %vm552_vm10 = vmmov 1   ;;  %vm343_vm12 = vcmask 596992  }
   0xb   :  { %v541_v23 = vld [vmem:[%s764_s0 + $0x14] ss:$0 sps:$4 sm:$0xff]   ;;  %vm504_vm11 = vmpackc.low %vm356_vm9, %vm552_vm10 }
   0xe   :  { %41 = vrot.lane.b32.xlu1 %v17_v1, %s542_s13  ;;  %23 = vrot.lane.b32.xlu0 %v21_v7, %s543_s14 }
  0x12   :  { %80 = vrot.lane.b32.xlu1 %v40_v2, %s545_s22  ;;  %60 = vrot.lane.b32.xlu0 %v21_v7, %s544_s21 }
  0x16   :  { %99 = vrot.lane.b32.xlu1 %v17_v1, %s546_s25  ;;  %82 = vrot.lane.b32.xlu0 %v74_v8, %s545_s22 }
  0x1a   :  { %117 = vrot.lane.b32.xlu1 %v40_v2, %s547_s28  ;;  %101 = vrot.lane.b32.xlu0 %v534_v9, %s546_s25 }
  0x1e   :  { %136 = vrot.lane.b32.xlu1 %v17_v1, %s548_s3  ;;  %119 = vrot.lane.b32.xlu0 %v111_v10, %s547_s28 }
  0x22   :  { %78 = vrot.lane.b32.xlu1 %v17_v1, %s545_s22  ;;  %138 = vrot.lane.b32.xlu0 %v535_v11, %s548_s3 }
  0x26   :  { %115 = vrot.lane.b32.xlu1 %v17_v1, %s547_s28  ;;  %97 = vrot.lane.b32.xlu0 %v21_v7, %s546_s25 }
  0x2a   :  { %154 = vrot.lane.b32.xlu1 %v40_v2, %s549_s6  ;;  %134 = vrot.lane.b32.xlu0 %v21_v7, %s548_s3 }
  0x2e   :  { %179 = vrot.lane.b32.xlu1 %v176_v12, %s543_s14  ;;  %156 = vrot.lane.b32.xlu0 %v148_v13, %s549_s6 }
  0x32   :  { %197 = vrot.lane.b32.xlu1 %v582_v4, %s542_s13  ;;  %181 = vrot.lane.b32.xlu0 %v466_v14, %s543_s14 }
  0x36   :  { %152 = vrot.lane.b32.xlu1 %v17_v1, %s549_s6  ;;  %199 = vrot.lane.b32.xlu0 %v538_v15, %s542_s13 }
  0x3a   :  { %195 = vrot.lane.b32.xlu1 %v591_v6, %s542_s13  ;;  %177 = vrot.lane.b32.xlu0 %v582_v4, %s543_s14 }
  0x3e   :  { %216 = vrot.lane.b32.xlu1 %v470_v16, %s544_s21  ;;  %214 = vrot.lane.b32.xlu0 %v176_v12, %s544_s21 }
  0x42   :  { %234 = vrot.lane.b32.xlu1 %v539_v17, %s545_s22  ;;  %232 = vrot.lane.b32.xlu0 %v582_v4, %s545_s22 }
  0x46   :  { %251 = vrot.lane.b32.xlu1 %v474_v18, %s546_s25  ;;  %249 = vrot.lane.b32.xlu0 %v176_v12, %s546_s25 }
  0x4a   :  { %269 = vrot.lane.b32.xlu1 %v540_v19, %s547_s28  ;;  %267 = vrot.lane.b32.xlu0 %v582_v4, %s547_s28 }
  0x4e   :  { %230 = vrot.lane.b32.xlu1 %v591_v6, %s545_s22  ;;  %212 = vrot.lane.b32.xlu0 %v582_v4, %s544_s21 }
  0x52   :  { %265 = vrot.lane.b32.xlu1 %v591_v6, %s547_s28  ;;  %247 = vrot.lane.b32.xlu0 %v582_v4, %s546_s25 }
  0x56   :  { %286 = vrot.lane.b32.xlu1 %v478_v22, %s548_s3  ;;  %284 = vrot.lane.b32.xlu0 %v176_v12, %s548_s3 }
  0x5a   :  { %304 = vrot.lane.b32.xlu1 %v541_v23, %s549_s6  ;;  %302 = vrot.lane.b32.xlu0 %v582_v4, %s549_s6 }
  0x5e   :  { %300 = vrot.lane.b32.xlu1 %v591_v6, %s549_s6  ;;  %282 = vrot.lane.b32.xlu0 %v582_v4, %s548_s3 }
  0x74   :  { %v46_v25 = vpop.permute.xlu1 %45  ;;  %v26_v26 = vpop.permute.xlu0 %25 }
  0x78   :  { %v44_v27 = vpop.permute.xlu1 %43  ;;  %v28_v28 = vpop.permute.xlu0 %27 }
  0x79   :  { %v49_v29 = vsel %vm47_vm1, %v44_v27, %v46_v25  ;;  %v31_v30 = vsel %vm29_vm2, %v26_v26, %v28_v28 }
  0x7a   :  { %53 = vst [vmem:[#allocation2 + $0x18] sm:$0xf] %v49_v29  ;;  %35 = vst [vmem:[#allocation2 + $0x8] sm:$0xf0] %v31_v30 }
  0x7c   :  { %v65_v31 = vpop.permute.xlu1 %64  ;;  %v63_v32 = vpop.permute.xlu0 %62 }
  0x7d   :  { %v68_v33 = vsel %vm66_vm3, %v63_v32, %v65_v31 }
  0x7e   :  { %72 = vst [vmem:[#allocation2 + $0x18] sm:$0xf0] %v68_v33 }
  0x80   :  { %v42_v34 = vpop.permute.xlu1 %41  ;;  %v24_v35 = vpop.permute.xlu0 %23 }
  0x81   :  { %v48_v36 = vsel %vm47_vm1, %v42_v34, %v44_v27  ;;  %v30_v37 = vsel %vm29_vm2, %v24_v35, %v26_v26  ;;  %v324_v41 = vld [vmem:[#allocation2 + $0x8] sm:$0xff] }
  0x82   :  { %52 = vst [vmem:[#allocation2 + $0x10] sm:$0xf] %v48_v36  ;;  %34 = vst [vmem:[#allocation2] sm:$0xf0] %v30_v37 }
  0x84   :  { %v81_v38 = vpop.permute.xlu1 %80  ;;  %v61_v39 = vpop.permute.xlu0 %60 }
  0x85   :  { %v67_v40 = vsel %vm66_vm3, %v61_v39, %v63_v32  ;;  %v326_v42 = vld [vmem:[#allocation2 + $0x18] sm:$0xff] }
  0x86   :  { %71 = vst [vmem:[#allocation2 + $0x10] sm:$0xf0] %v67_v40  ;;  %v487_v43 = vpack.c.bf16 %v326_v42, %v324_v41 }
  0x88   :  { %v100_v44 = vpop.permute.xlu1 %99  ;;  %v83_v45 = vpop.permute.xlu0 %82  ;;  %488 = vmatprep.subr.bf16.mxu0 %v487_v43  ;;  %509 = vmatprep.subr.bf16.mxu1 %v487_v43 }
  0x89   :  { %v86_v46 = vsel %vm84_vm4, %v81_v38, %v83_v45  ;;  %v323_v50 = vld [vmem:[#allocation2] sm:$0xff] }
  0x8a   :  { %90 = vst [vmem:[#allocation2 + $0x28] sm:$0xf] %v86_v46 }
  0x8c   :  { %v118_v47 = vpop.permute.xlu1 %117  ;;  %v102_v48 = vpop.permute.xlu0 %101 }
  0x8d   :  { %v105_v49 = vsel %vm103_vm5, %v100_v44, %v102_v48  ;;  %v325_v51 = vld [vmem:[#allocation2 + $0x10] sm:$0xff] }
  0x8e   :  { %109 = vst [vmem:[#allocation2 + $0x28] sm:$0xf0] %v105_v49  ;;  %v489_v52 = vpack.c.bf16 %v325_v51, %v323_v50 }
  0x90   :  { %v137_v53 = vpop.permute.xlu1 %136  ;;  %v120_v54 = vpop.permute.xlu0 %119  ;;  %490 = vmatpush1.bf16.msra.mxu0 %v489_v52  ;;  %514 = vmatpush1.bf16.msra.mxu1 %v489_v52 }
  0x91   :  { %v123_v55 = vsel %vm121_vm6, %v118_v47, %v120_v54 }
  0x92   :  { %127 = vst [vmem:[#allocation2 + $0x38] sm:$0xf] %v123_v55 }
  0x94   :  { %v79_v56 = vpop.permute.xlu1 %78  ;;  %v139_v57 = vpop.permute.xlu0 %138 }
  0x95   :  { %v85_v58 = vsel %vm84_vm4, %v79_v56, %v81_v38  ;;  %v142_v59 = vsel %vm140_vm7, %v137_v53, %v139_v57  ;;  %v328_v3 = vld [vmem:[#allocation2 + $0x28] sm:$0xff] }
  0x96   :  { %89 = vst [vmem:[#allocation2 + $0x20] sm:$0xf] %v85_v58  ;;  %146 = vst [vmem:[#allocation2 + $0x38] sm:$0xf0] %v142_v59 }
  0x98   :  { %v116_v60 = vpop.permute.xlu1 %115  ;;  %v98_v61 = vpop.permute.xlu0 %97 }
  0x99   :  { %v122_v62 = vsel %vm121_vm6, %v116_v60, %v118_v47  ;;  %v104_v63 = vsel %vm103_vm5, %v98_v61, %v100_v44 }
  0x9a   :  { %126 = vst [vmem:[#allocation2 + $0x30] sm:$0xf] %v122_v62  ;;  %108 = vst [vmem:[#allocation2 + $0x20] sm:$0xf0] %v104_v63 }
  0x9c   :  { %v155_v0 = vpop.permute.xlu1 %154  ;;  %v135_v1 = vpop.permute.xlu0 %134 }
  0x9d   :  { %v141_v2 = vsel %vm140_vm7, %v135_v1, %v137_v53  ;;  %v330_v4 = vld [vmem:[#allocation2 + $0x38] sm:$0xff] }
  0x9e   :  { %145 = vst [vmem:[#allocation2 + $0x30] sm:$0xf0] %v141_v2  ;;  %v491_v5 = vpack.c.bf16 %v330_v4, %v328_v3  ;;  %v342_v2 = vld [vmem:[#allocation2 + $0x98] sm:$0x1] }
  0xa0   :  { %v180_v6 = vpop.permute.xlu1 %179  ;;  %v157_v7 = vpop.permute.xlu0 %156  ;;  %492 = vmatprep.subr.bf16.mxu0 %v491_v5  ;;  %510 = vmatprep.subr.bf16.mxu1 %v491_v5  ;;  %v341_v5 = vld [vmem:[#allocation2 + $0x90] sm:$0x1] }
  0xa1   :  { %v160_v8 = vsel %vm158_vm8, %v155_v0, %v157_v7  ;;  %v327_v12 = vld [vmem:[#allocation2 + $0x20] sm:$0xff] }
  0xa2   :  { %164 = vst [vmem:[#allocation2 + $0x48] sm:$0xf] %v160_v8  ;;  %v319_v8 = vld [vmem:[%s765_s1] sm:$0xff] }
  0xa4   :  { %v198_v9 = vpop.permute.xlu1 %197  ;;  %v182_v10 = vpop.permute.xlu0 %181 }
  0xa5   :  { %v184_v11 = vsel %vm29_vm2, %v180_v6, %v182_v10  ;;  %v329_v13 = vld [vmem:[#allocation2 + $0x30] sm:$0xff]  ;;  %v320_v10 = vld [vmem:[%s765_s1 + $0x8] sm:$0xff] }
  0xa6   :  { %188 = vst [vmem:[#allocation2 + $0x58] sm:$0xf] %v184_v11  ;;  %v493_v14 = vpack.c.bf16 %v329_v13, %v327_v12  ;;  %v322_v11 = vld [vmem:[%s765_s1 + $0x18] sm:$0xff] }
  0xa8   :  { %v153_v15 = vpop.permute.xlu1 %152  ;;  %v200_v16 = vpop.permute.xlu0 %199  ;;  %494 = vmatpush1.bf16.msra.mxu0 %v493_v14  ;;  %515 = vmatpush1.bf16.msra.mxu1 %v493_v14 }
  0xa9   :  { %v159_v17 = vsel %vm158_vm8, %v153_v15, %v155_v0  ;;  %v202_v18 = vsel %vm47_vm1, %v198_v9, %v200_v16  ;;  %v332_v27 = vld [vmem:[#allocation2 + $0x48] sm:$0xff] }
  0xaa   :  { %163 = vst [vmem:[#allocation2 + $0x40] sm:$0xf] %v159_v17  ;;  %206 = vst [vmem:[#allocation2 + $0x58] sm:$0xf0] %v202_v18 }
  0xac   :  { %v196_v19 = vpop.permute.xlu1 %195  ;;  %v178_v20 = vpop.permute.xlu0 %177 }
  0xad   :  { %v201_v21 = vsel %vm47_vm1, %v196_v19, %v198_v9  ;;  %v183_v22 = vsel %vm29_vm2, %v178_v20, %v180_v6  ;;  %v321_v9 = vld [vmem:[%s765_s1 + $0x10] sm:$0xff] }
  0xae   :  { %205 = vst [vmem:[#allocation2 + $0x50] sm:$0xf0] %v201_v21  ;;  %187 = vst [vmem:[#allocation2 + $0x50] sm:$0xf] %v183_v22 }
  0xb0   :  { %v217_v23 = vpop.permute.xlu1 %216  ;;  %v215_v25 = vpop.permute.xlu0 %214 }
  0xb1   :  { %v219_v26 = vsel %vm66_vm3, %v215_v25, %v217_v23  ;;  %v334_v28 = vld [vmem:[#allocation2 + $0x58] sm:$0xff]  ;;  %v331_v33 = vld [vmem:[#allocation2 + $0x40] sm:$0xff] }
  0xb2   :  { %223 = vst [vmem:[#allocation2 + $0x68] sm:$0xf] %v219_v26  ;;  %v495_v29 = vpack.c.bf16 %v334_v28, %v332_v27 }
  0xb4   :  { %v235_v30 = vpop.permute.xlu1 %234  ;;  %v233_v31 = vpop.permute.xlu0 %232  ;;  %496 = vmatprep.subr.bf16.mxu0 %v495_v29  ;;  %511 = vmatprep.subr.bf16.mxu1 %v495_v29 }
  0xb5   :  { %v237_v32 = vsel %vm84_vm4, %v233_v31, %v235_v30  ;;  %v333_v34 = vld [vmem:[#allocation2 + $0x50] sm:$0xff] }
  0xb6   :  { %241 = vst [vmem:[#allocation2 + $0x68] sm:$0xf0] %v237_v32  ;;  %v497_v35 = vpack.c.bf16 %v333_v34, %v331_v33 }
  0xb8   :  { %v252_v36 = vpop.permute.xlu1 %251  ;;  %v250_v37 = vpop.permute.xlu0 %249  ;;  %498 = vmatpush1.bf16.msra.mxu0 %v497_v35  ;;  %516 = vmatpush1.bf16.msra.mxu1 %v497_v35 }
  0xb9   :  { %v254_v38 = vsel %vm103_vm5, %v250_v37, %v252_v36 }
  0xba   :  { %258 = vst [vmem:[#allocation2 + $0x78] sm:$0xf] %v254_v38 }
  0xbc   :  { %v270_v39 = vpop.permute.xlu1 %269  ;;  %v268_v40 = vpop.permute.xlu0 %267 }
  0xbd   :  { %v272_v41 = vsel %vm121_vm6, %v268_v40, %v270_v39  ;;  %v336_v50 = vld [vmem:[#allocation2 + $0x68] sm:$0xff] }
  0xbe   :  { %276 = vst [vmem:[#allocation2 + $0x78] sm:$0xf0] %v272_v41 }
  0xc0   :  { %v231_v42 = vpop.permute.xlu1 %230  ;;  %v213_v43 = vpop.permute.xlu0 %212 }
  0xc1   :  { %v236_v44 = vsel %vm84_vm4, %v231_v42, %v233_v31  ;;  %v218_v45 = vsel %vm66_vm3, %v213_v43, %v215_v25 }
  0xc2   :  { %240 = vst [vmem:[#allocation2 + $0x60] sm:$0xf0] %v236_v44  ;;  %222 = vst [vmem:[#allocation2 + $0x60] sm:$0xf] %v218_v45 }
  0xc4   :  { %v266_v46 = vpop.permute.xlu1 %265  ;;  %v248_v47 = vpop.permute.xlu0 %247 }
  0xc5   :  { %v271_v48 = vsel %vm121_vm6, %v266_v46, %v268_v40  ;;  %v253_v49 = vsel %vm103_vm5, %v248_v47, %v250_v37  ;;  %v338_v51 = vld [vmem:[#allocation2 + $0x78] sm:$0xff] }
  0xc6   :  { %275 = vst [vmem:[#allocation2 + $0x70] sm:$0xf0] %v271_v48  ;;  %257 = vst [vmem:[#allocation2 + $0x70] sm:$0xf] %v253_v49  ;;  %v499_v52 = vpack.c.bf16 %v338_v51, %v336_v50 }
  0xc8   :  { %v287_v53 = vpop.permute.xlu1 %286  ;;  %v285_v54 = vpop.permute.xlu0 %284  ;;  %500 = vmatprep.subr.bf16.mxu0 %v499_v52  ;;  %512 = vmatprep.subr.bf16.mxu1 %v499_v52 }
  0xc9   :  { %v289_v55 = vsel %vm140_vm7, %v285_v54, %v287_v53  ;;  %v335_v59 = vld [vmem:[#allocation2 + $0x60] sm:$0xff] }
  0xca   :  { %293 = vst [vmem:[#allocation2 + $0x88] sm:$0xf] %v289_v55 }
  0xcc   :  { %v305_v56 = vpop.permute.xlu1 %304  ;;  %v303_v57 = vpop.permute.xlu0 %302 }
  0xcd   :  { %v307_v58 = vsel %vm158_vm8, %v303_v57, %v305_v56  ;;  %v337_v60 = vld [vmem:[#allocation2 + $0x70] sm:$0xff] }
  0xce   :  { %311 = vst [vmem:[#allocation2 + $0x88] sm:$0xf0] %v307_v58  ;;  %v501_v61 = vpack.c.bf16 %v337_v60, %v335_v59 }
  0xd0   :  { %v301_v62 = vpop.permute.xlu1 %300  ;;  %v283_v63 = vpop.permute.xlu0 %282  ;;  %502 = vmatpush1.bf16.msra.mxu0 %v501_v61  ;;  %517 = vmatpush1.bf16.msra.mxu1 %v501_v61 }
  0xd1   :  { %v306_v0 = vsel %vm158_vm8, %v301_v62, %v303_v57  ;;  %v288_v1 = vsel %vm140_vm7, %v283_v63, %v285_v54 }
  0xd2   :  { %310 = vst [vmem:[#allocation2 + $0x80] sm:$0xf0] %v306_v0  ;;  %292 = vst [vmem:[#allocation2 + $0x80] sm:$0xf] %v288_v1 }
  0xd5   :  { %v340_v3 = vld [vmem:[#allocation2 + $0x88] sm:$0xff] }
  0xd6   :  { %v503_v4 = vpack.c.bf16 %v342_v2, %v340_v3 }
  0xd8   :  { %505 = vmatprep.subr.msk.bf16.mxu0 %vm504_vm11, %v503_v4  ;;  %513 = vmatprep.subr.msk.bf16.mxu1 %vm504_vm11, %v503_v4 }
  0xd9   :  { %v339_v6 = vld [vmem:[#allocation2 + $0x80] sm:$0xff] }
  0xda   :  { %v506_v7 = vpack.c.bf16 %v341_v5, %v339_v6 }
  0xdc   :  { %508 = vmatpush1.bf16.msk.msra.mxu0 %vm504_vm11, %v506_v7  ;;  %518 = vmatpush1.bf16.msk.msra.mxu1 %vm504_vm11, %v506_v7 }
  0xdf   :  { %483 = vmatmul.mubr.msk.f32.vlgmr.msra.gmra.mrb[0].mxu0 %vm343_vm12, %v319_v8  ;;  %485 = vmatmul.mubr.msk.f32.vlgmr.msra.gmra.mrb[0].mxu1 %vm343_vm12, %v321_v9 }
  0xe0   :  { %433 = vmatprep.mubr.f32.mxu0 %v551_v24  ;;  %445 = vmatprep.mubr.f32.mxu1 %v551_v24 }
  0xe3   :  { %484 = vmatmul.mubr.msk.f32.gmra.mrb[2].mxu0 %vm343_vm12, %v320_v10  ;;  %486 = vmatmul.mubr.msk.f32.gmra.mrb[2].mxu1 %vm343_vm12, %v322_v11 }
 0x1b2   :  { %v429_v12 = vpop.f32.mrb[0].mxu0  ;;  %v441_v13 = vpop.f32.mrb[0].mxu1 }
 0x1b3   :  { %452 = vst [vmem:[%s766_s2] sm:$0xff] %v429_v12  ;;  %456 = vst [vmem:[%s766_s2 + $0x20] sm:$0xff] %v441_v13  ;;  %v431_v24 = vpop.f32.mrb[1].mxu0  ;;  %v443_v14 = vpop.f32.mrb[1].mxu1 }
 0x1b4   :  { %453 = vst [vmem:[%s766_s2 + $0x8] sm:$0xff] %v431_v24  ;;  %457 = vst [vmem:[%s766_s2 + $0x28] sm:$0xff] %v443_v14 }
 0x1b6   :  { %v435_v15 = vpop.f32.mrb[2].mxu0  ;;  %v447_v16 = vpop.f32.mrb[2].mxu1 }
 0x1b7   :  { %454 = vst [vmem:[%s766_s2 + $0x10] sm:$0xff] %v435_v15  ;;  %458 = vst [vmem:[%s766_s2 + $0x30] sm:$0xff] %v447_v16  ;;  %v437_v17 = vpop.f32.mrb[3].mxu0  ;;  %v449_v18 = vpop.f32.mrb[3].mxu1 }
 0x1b8   :  { %455 = vst [vmem:[%s766_s2 + $0x18] sm:$0xff] %v437_v17  ;;  %459 = vst [vmem:[%s766_s2 + $0x38] sm:$0xff] %v449_v18 }

</bundles_post_ra>
